<compile_context>
chip_gen: v7x
topology: tpu7x:2x2x1
jax: 0.10.0
libtpu: 0.0.40
codegen_flags: <defaults>
</compile_context>

<pallas_src>
import functools

import jax
import jax.numpy as jnp
from jax.experimental import pallas as pl
from jax.experimental.pallas import tpu as pltpu


def _attention_kernel(hidden_ref, enc_ref, w_h_ref, w_e_ref, b_ref, v_row_ref,
                      ctx_ref, attn_ref, *, mxu_dtype):
    h = hidden_ref[...]                          # (TB, D), stored dtype
    enc = enc_ref[...]                           # (TB, S, E), stored dtype
    tb, s_len, e_dim = enc.shape
    d_dim = h.shape[-1]

    # "concat([hidden, enc]) @ W_attn" split into two matmuls.
    # Hidden part, with the attention bias folded in once (saves a (TB,S,D) add):
    hw = jnp.dot(h.astype(mxu_dtype), w_h_ref[...],
                 preferred_element_type=jnp.float32)                    # (TB, D) f32
    hb = hw + b_ref[...]                                                # (TB, D) f32

    # Encoder part, flattened into one big (TB*S, E) @ (E, D) MXU matmul.
    # TODO(synk): if S % 8 != 0 this reshape may relayout the enc tile in VMEM;
    # pad S to a multiple of 8 at encoder-output time if that shows up in MLIR.
    enc2d = enc.reshape(tb * s_len, e_dim).astype(mxu_dtype)
    ew = jnp.dot(enc2d, w_e_ref[...], preferred_element_type=jnp.float32)
    a = jnp.tanh(ew.reshape(tb, s_len, d_dim) + hb[:, None, :])         # (TB,S,D) f32

    # Width-1 "v" projection: VPU multiply + lane reduce (an N=1 MXU matmul
    # would waste the MXU).  v_b omitted: softmax is shift-invariant.
    scores = jnp.sum(a * v_row_ref[...], axis=-1)                       # (TB, S) lane-dense

    # Exact softmax over the sequence axis (attention weights are returned to
    # the caller, so keep each row summing to 1; the divide is on (TB,1) only).
    m = jnp.max(scores, axis=-1, keepdims=True)
    e = jnp.exp(scores - m)
    denom = jnp.sum(e, axis=-1, keepdims=True)
    attn = e * (1.0 / denom)                                            # (TB, S) f32

    # Context from enc in its NATIVE dtype; any upcast fuses per-vreg, no
    # explicit (TB,S,E) f32 copy of the tile is materialized.
    ctx = jnp.sum(attn[:, :, None] * enc, axis=1)                       # (TB, E) f32

    ctx_ref[...] = ctx.astype(ctx_ref.dtype)
    attn_ref[...] = attn


def _tpu_vmem_capacity_bytes():
    try:
        info = pltpu.get_tpu_info()
        cap = getattr(info, "vmem_capacity_bytes", None)
        if cap:
            return int(cap)
    except Exception:
        pass
    return 64 * 1024 * 1024  # conservative (v7x-sized) fallback


def _pick_tile_and_vmem(B, S, E, D, enc_itemsize, hid_itemsize, compute_itemsize,
                        max_batch_tile):
    cap = _tpu_vmem_capacity_bytes()
    # v7x (64 MiB)  -> 48 MiB limit;  v5e/v6e (128 MiB) -> 112 MiB limit.
    vmem_limit = min(max(cap - 16 * 1024 * 1024, 32 * 1024 * 1024), 112 * 1024 * 1024)

    # Conservative per-batch-row VMEM footprint of one grid step.
    per_row = (
        2 * S * E * enc_itemsize            # enc input block, double-buffered
        + S * E * compute_itemsize          # in-kernel MXU-dtype copy of the enc tile
        + 2 * S * D * 4                     # ew + tanh energies, f32
        + S * E * 4                         # attn-weighted product before the S-reduce
        + 2 * (E + S) * 4                   # ctx / attn output blocks, double-buffered
        + 2 * D * hid_itemsize + 2 * D * 4  # hidden block + projections
    )
    fixed = 2 * (D * D + E * D) * compute_itemsize + 4 * D * 4  # weights + bias/v rows
    headroom = 6 * 1024 * 1024
    budget_rows = max(8, int((vmem_limit - fixed - headroom) // per_row))

    max_tb = min(max_batch_tile, budget_rows)
    max_tb = max(8, (max_tb // 8) * 8)

    if B >= 16:
        # Guarantee >= 2 grid tiles so v7x's two TensorCores both get work.
        half = ((B + 1) // 2 + 7) // 8 * 8
        tb = min(max_tb, half)
    elif B <= max_tb:
        tb = B                              # single full-extent tile (block == array dim)
    else:
        tb = max_tb
    return tb, vmem_limit


def attention_forward(hidden, encoder_outputs_list, params, *,
                      max_batch_tile=256,
                      compute_dtype=jnp.bfloat16,
                      vmem_limit_bytes=None):
    """hidden: (B, dec_hid); encoder_outputs_list: [(B, S, enc_hid)].

    compute_dtype controls only the MXU inputs of the energy matmul; softmax,
    tanh, accumulation and the context sum are always float32.
    """
    enc = encoder_outputs_list[0]
    B, S, E = enc.shape
    D = hidden.shape[1]

    # Only the SMALL weights are cast in the wrapper; enc/hidden stream into
    # the kernel in their stored dtype (no extra HBM pass over the big tensor).
    w_attn = params["attn_w"]                               # (D + E, D), concat order (hidden, enc)
    w_h = w_attn[:D, :].astype(compute_dtype)               # (D, D)
    w_e = w_attn[D:, :].astype(compute_dtype)               # (E, D)
    b2 = params["attn_b"].reshape(1, D).astype(jnp.float32)
    v_row = params["v_w"].reshape(1, D).astype(jnp.float32)

    tb, auto_vmem = _pick_tile_and_vmem(
        B, S, E, D,
        jnp.dtype(enc.dtype).itemsize, jnp.dtype(hidden.dtype).itemsize,
        jnp.dtype(compute_dtype).itemsize, max_batch_tile)
    if vmem_limit_bytes is None:
        vmem_limit_bytes = auto_vmem
    num_tiles = pl.cdiv(B, tb)

    kernel = functools.partial(_attention_kernel, mxu_dtype=compute_dtype)

    # TODO(synk): pipeline_mode=pl.Buffered(1) on the constant weight/bias specs
    # would reclaim ~(D*D + E*D)*itemsize of VMEM on v7x; left at the default
    # double-buffering for broad jax-version compatibility.
    ctx, attn = pl.pallas_call(
        kernel,
        out_shape=(
            jax.ShapeDtypeStruct((B, E), jnp.float32),
            jax.ShapeDtypeStruct((B, S), jnp.float32),
        ),
        grid_spec=pltpu.PrefetchScalarGridSpec(
            num_scalar_prefetch=0,
            grid=(num_tiles,),
            in_specs=[
                pl.BlockSpec((tb, D), lambda b: (b, 0)),          # hidden tile (native dtype)
                pl.BlockSpec((tb, S, E), lambda b: (b, 0, 0)),    # encoder tile (native dtype)
                pl.BlockSpec((D, D), lambda b: (0, 0)),           # W_h
                pl.BlockSpec((E, D), lambda b: (0, 0)),           # W_e
                pl.BlockSpec((1, D), lambda b: (0, 0)),           # attn bias row
                pl.BlockSpec((1, D), lambda b: (0, 0)),           # v weight row
            ],
            out_specs=[
                pl.BlockSpec((tb, E), lambda b: (b, 0)),          # context vectors
                pl.BlockSpec((tb, S), lambda b: (b, 0)),          # attention weights (lane-dense)
            ],
        ),
        compiler_params=pltpu.CompilerParams(
            dimension_semantics=("parallel",),
            vmem_limit_bytes=vmem_limit_bytes,
        ),
    )(hidden, enc, w_h, w_e, b2, v_row)

    return ctx, [attn]


def _reference_forward(hidden, encoder_outputs_list, params):
    enc = encoder_outputs_list[0]
    B, S, E = enc.shape
    h = jnp.repeat(hidden[:, None, :], S, axis=1)                 # (B, S, D)
    concat = jnp.concatenate([h, enc], axis=-1)                   # (B, S, D+E)
    a = jnp.tanh(concat @ params["attn_w"] + params["attn_b"])    # (B, S, D)
    s = a @ params["v_w"] + params["v_b"]                         # (B, S, 1)
    attn = jax.nn.softmax(s, axis=1)
    ctx = jnp.sum(attn * enc, axis=1)                             # (B, E)
    return ctx, [attn[..., 0]]


def init_params(key, enc_hid, dec_hid):
    k1, k2, k3, k4 = jax.random.split(key, 4)
    fan_in_attn = enc_hid + dec_hid
    bound1 = 1.0 / jnp.sqrt(fan_in_attn)
    bound2 = 1.0 / jnp.sqrt(dec_hid)
    return {
        # stored transposed relative to torch nn.Linear.weight for direct x @ W use
        "attn_w": jax.random.uniform(k1, (fan_in_attn, dec_hid), jnp.float32,
                                     -bound1, bound1),
        "attn_b": jax.random.uniform(k2, (dec_hid,), jnp.float32, -bound1, bound1),
        "v_w": jax.random.uniform(k3, (dec_hid, 1), jnp.float32, -bound2, bound2),
        "v_b": jax.random.uniform(k4, (1,), jnp.float32, -bound2, bound2),
    }


# TODO(synk): the CNN encoder, LSTM decoder step (embedding + LSTMCell + output
# projection) and the autoregressive sampling loop of CaptionNetWithAttention are
# external submodules / host-side control flow and are not implemented here; only
# the decoder's additive-attention core is expressed as a Pallas kernel.

if __name__ == "__main__":
    B, S = 2, 8
    enc_hid, dec_hid = 32, 32

    key = jax.random.PRNGKey(0)
    kp, kh, ke = jax.random.split(key, 3)

    params = init_params(kp, enc_hid, dec_hid)
    hidden = jax.random.normal(kh, (B, dec_hid), jnp.float32)
    encoder_outputs = jax.random.normal(ke, (B, S, enc_hid), jnp.float32)

    ctx_ref, attn_ref_list = _reference_forward(hidden, [encoder_outputs], params)

    # f32 MXU path (tight tolerance; softmax divide is exact).
    ctx, attn_list = attention_forward(hidden, [encoder_outputs], params,
                                       compute_dtype=jnp.float32)
    jax.block_until_ready(ctx)
    jax.block_until_ready(attn_list[0])
    assert jnp.allclose(ctx, ctx_ref, atol=5e-3, rtol=5e-3)
    assert jnp.allclose(attn_list[0], attn_ref_list[0], atol=5e-3, rtol=5e-3)

    # Default path: bf16 MXU inputs (fast path on all generations); accumulation,
    # softmax and the context sum stay f32 -> loose tolerance.
    ctx_bf, attn_bf_list = attention_forward(hidden, [encoder_outputs], params)
    jax.block_until_ready(ctx_bf)
    jax.block_until_ready(attn_bf_list[0])
    assert jnp.allclose(ctx_bf, ctx_ref, atol=5e-2, rtol=5e-2)
    assert jnp.allclose(attn_bf_list[0], attn_ref_list[0], atol=5e-2, rtol=5e-2)

    print("KERNEL_OK")
</pallas_src>

<mosaic_0001>
module attributes {stable_mosaic.version = 11 : i64} {
  func.func @_attention_kernel(%arg0: i32, %arg1: memref<2x32xf32, #tpu.memory_space<vmem>>, %arg2: memref<2x8x32xf32, #tpu.memory_space<vmem>>, %arg3: memref<32x32xf32, #tpu.memory_space<vmem>>, %arg4: memref<32x32xf32, #tpu.memory_space<vmem>>, %arg5: memref<1x32xf32, #tpu.memory_space<vmem>>, %arg6: memref<1x32xf32, #tpu.memory_space<vmem>>, %arg7: memref<2x32xf32, #tpu.memory_space<vmem>>, %arg8: memref<2x8xf32, #tpu.memory_space<vmem>>) attributes {dimension_semantics = [#tpu.dimension_semantics<parallel>], iteration_bounds = array<i64: 1>, scalar_prefetch = 0 : i64, scratch_operands = 0 : i64, tpu.core_type = #tpu.core_type<tc>, window_params = [{transform_indices = @transform_0, window_bounds = array<i64: 2, 32>}, {transform_indices = @transform_1, window_bounds = array<i64: 2, 8, 32>}, {pipeline_mode = #tpu.pipeline_mode<synchronous>, transform_indices = @transform_2, window_bounds = array<i64: 32, 32>}, {pipeline_mode = #tpu.pipeline_mode<synchronous>, transform_indices = @transform_3, window_bounds = array<i64: 32, 32>}, {pipeline_mode = #tpu.pipeline_mode<synchronous>, transform_indices = @transform_4, window_bounds = array<i64: 1, 32>}, {pipeline_mode = #tpu.pipeline_mode<synchronous>, transform_indices = @transform_5, window_bounds = array<i64: 1, 32>}, {transform_indices = @transform_6, window_bounds = array<i64: 2, 32>}, {transform_indices = @transform_7, window_bounds = array<i64: 2, 8>}]} {
    %c0 = arith.constant 0 : index
    %c0_0 = arith.constant 0 : index
    %0 = vector.load %arg1[%c0, %c0_0] : memref<2x32xf32, #tpu.memory_space<vmem>>, vector<2x32xf32>
    %c0_1 = arith.constant 0 : index
    %c0_2 = arith.constant 0 : index
    %c0_3 = arith.constant 0 : index
    %1 = vector.load %arg2[%c0_1, %c0_2, %c0_3] : memref<2x8x32xf32, #tpu.memory_space<vmem>>, vector<2x8x32xf32>
    %c0_4 = arith.constant 0 : index
    %c0_5 = arith.constant 0 : index
    %2 = vector.load %arg3[%c0_4, %c0_5] : memref<32x32xf32, #tpu.memory_space<vmem>>, vector<32x32xf32>
    %cst = arith.constant dense<0.000000e+00> : vector<2x32xf32>
    %3 = tpu.matmul %0, %2, %cst {dimension_numbers = #tpu.dot_dimension_numbers<[1], [0], [0], [1], [0, 0, 1, 1], [], []>} : vector<2x32xf32>, vector<32x32xf32>, vector<2x32xf32> -> vector<2x32xf32>
    %c0_6 = arith.constant 0 : index
    %c0_7 = arith.constant 0 : index
    %4 = vector.load %arg5[%c0_6, %c0_7] : memref<1x32xf32, #tpu.memory_space<vmem>>, vector<1x32xf32>
    %5 = vector.broadcast %4 : vector<1x32xf32> to vector<2x32xf32>
    %6 = arith.addf %3, %5 : vector<2x32xf32>
    %7 = vector.shape_cast %1 : vector<2x8x32xf32> to vector<16x32xf32>
    %c0_8 = arith.constant 0 : index
    %c0_9 = arith.constant 0 : index
    %8 = vector.load %arg4[%c0_8, %c0_9] : memref<32x32xf32, #tpu.memory_space<vmem>>, vector<32x32xf32>
    %cst_10 = arith.constant dense<0.000000e+00> : vector<16x32xf32>
    %9 = tpu.matmul %7, %8, %cst_10 {dimension_numbers = #tpu.dot_dimension_numbers<[1], [0], [0], [1], [0, 0, 1, 1], [], []>} : vector<16x32xf32>, vector<32x32xf32>, vector<16x32xf32> -> vector<16x32xf32>
    %10 = vector.shape_cast %9 : vector<16x32xf32> to vector<2x8x32xf32>
    %11 = vector.shape_cast %6 : vector<2x32xf32> to vector<2x1x32xf32>
    %12 = vector.broadcast %11 : vector<2x1x32xf32> to vector<2x8x32xf32>
    %13 = arith.addf %10, %12 : vector<2x8x32xf32>
    %14 = math.tanh %13 : vector<2x8x32xf32>
    %c0_11 = arith.constant 0 : index
    %c0_12 = arith.constant 0 : index
    %15 = vector.load %arg6[%c0_11, %c0_12] : memref<1x32xf32, #tpu.memory_space<vmem>>, vector<1x32xf32>
    %16 = vector.shape_cast %15 : vector<1x32xf32> to vector<1x1x32xf32>
    %17 = vector.broadcast %16 : vector<1x1x32xf32> to vector<2x8x32xf32>
    %18 = arith.mulf %14, %17 : vector<2x8x32xf32>
    %cst_13 = arith.constant dense<0.000000e+00> : vector<2x8xf32>
    %19 = vector.multi_reduction <add>, %18, %cst_13 [2] : vector<2x8x32xf32> to vector<2x8xf32>
    %cst_14 = arith.constant dense<0xFF800000> : vector<2xf32>
    %20 = vector.multi_reduction <maximumf>, %19, %cst_14 [1] : vector<2x8xf32> to vector<2xf32>
    %21 = vector.shape_cast %20 : vector<2xf32> to vector<2x1xf32>
    %22 = vector.broadcast %21 : vector<2x1xf32> to vector<2x8xf32>
    %23 = arith.subf %19, %22 : vector<2x8xf32>
    %24 = math.exp %23 : vector<2x8xf32>
    %cst_15 = arith.constant dense<0.000000e+00> : vector<2xf32>
    %25 = vector.multi_reduction <add>, %24, %cst_15 [1] : vector<2x8xf32> to vector<2xf32>
    %26 = vector.shape_cast %25 : vector<2xf32> to vector<2x1xf32>
    %cst_16 = arith.constant 1.000000e+00 : f32
    %27 = vector.broadcast %cst_16 : f32 to vector<2x1xf32>
    %28 = arith.divf %27, %26 : vector<2x1xf32>
    %29 = vector.broadcast %28 : vector<2x1xf32> to vector<2x8xf32>
    %30 = arith.mulf %24, %29 : vector<2x8xf32>
    %31 = vector.shape_cast %30 : vector<2x8xf32> to vector<2x8x1xf32>
    %32 = vector.broadcast %31 : vector<2x8x1xf32> to vector<2x8x32xf32>
    %33 = arith.mulf %32, %1 : vector<2x8x32xf32>
    %cst_17 = arith.constant dense<0.000000e+00> : vector<2x32xf32>
    %34 = vector.multi_reduction <add>, %33, %cst_17 [1] : vector<2x8x32xf32> to vector<2x32xf32>
    %c0_18 = arith.constant 0 : index
    %c0_19 = arith.constant 0 : index
    %35 = vector.load %arg7[%c0_18, %c0_19] : memref<2x32xf32, #tpu.memory_space<vmem>>, vector<2x32xf32>
    tpu.vector_store %arg7[%c0_18, %c0_19], %34 {strides = array<i32>} : memref<2x32xf32, #tpu.memory_space<vmem>>, vector<2x32xf32>,
    %c0_20 = arith.constant 0 : index
    %c0_21 = arith.constant 0 : index
    %36 = vector.load %arg8[%c0_20, %c0_21] : memref<2x8xf32, #tpu.memory_space<vmem>>, vector<2x8xf32>
    tpu.vector_store %arg8[%c0_20, %c0_21], %30 {strides = array<i32>} : memref<2x8xf32, #tpu.memory_space<vmem>>, vector<2x8xf32>,
    return
  }
  func.func @transform_0(%arg0: i32) -> (i32, i32) {
    %c0_i32 = arith.constant 0 : i32
    %c0_i32_0 = arith.constant 0 : i32
    return %arg0, %c0_i32 : i32, i32
  }
  func.func @transform_1(%arg0: i32) -> (i32, i32, i32) {
    %c0_i32 = arith.constant 0 : i32
    %c0_i32_0 = arith.constant 0 : i32
    %c0_i32_1 = arith.constant 0 : i32
    return %arg0, %c0_i32, %c0_i32_0 : i32, i32, i32
  }
  func.func @transform_2(%arg0: i32) -> (i32, i32) {
    %c0_i32 = arith.constant 0 : i32
    %c0_i32_0 = arith.constant 0 : i32
    %c0_i32_1 = arith.constant 0 : i32
    return %c0_i32, %c0_i32_0 : i32, i32
  }
  func.func @transform_3(%arg0: i32) -> (i32, i32) {
    %c0_i32 = arith.constant 0 : i32
    %c0_i32_0 = arith.constant 0 : i32
    %c0_i32_1 = arith.constant 0 : i32
    return %c0_i32, %c0_i32_0 : i32, i32
  }
  func.func @transform_4(%arg0: i32) -> (i32, i32) {
    %c0_i32 = arith.constant 0 : i32
    %c0_i32_0 = arith.constant 0 : i32
    %c0_i32_1 = arith.constant 0 : i32
    return %c0_i32, %c0_i32_0 : i32, i32
  }
  func.func @transform_5(%arg0: i32) -> (i32, i32) {
    %c0_i32 = arith.constant 0 : i32
    %c0_i32_0 = arith.constant 0 : i32
    %c0_i32_1 = arith.constant 0 : i32
    return %c0_i32, %c0_i32_0 : i32, i32
  }
  func.func @transform_6(%arg0: i32) -> (i32, i32) {
    %c0_i32 = arith.constant 0 : i32
    %c0_i32_0 = arith.constant 0 : i32
    return %arg0, %c0_i32 : i32, i32
  }
  func.func @transform_7(%arg0: i32) -> (i32, i32) {
    %c0_i32 = arith.constant 0 : i32
    %c0_i32_0 = arith.constant 0 : i32
    return %arg0, %c0_i32 : i32, i32
  }
}

</mosaic_0001>

<bundles_post_ra>
// kernel: tpu_custom_call.1
= control target key start
LH: loop header
LB: loop body
LE: loop exit
PB: predicated region body
PF: predicated region fallthrough
CT: control target
= control target key end

     0   :  { %13 = vsyncpa [#allocation3], 0  ;;  %s838_s0 = inlined_call_operand.hbm [shape: f32[2,32], index: 0, kind: input, shape index: {}]   ;;  %s839_s1 = inlined_call_operand.hbm [shape: f32[2,8,32], index: 1, kind: input, shape index: {}]   ;;  %s840_s2 = inlined_call_operand.hbm [shape: f32[32,32], index: 2, kind: input, shape index: {}]   ;;  %s841_s3 = inlined_call_operand.hbm [shape: f32[32,32], index: 3, kind: input, shape index: {}]   ;;  %s842_s4 = inlined_call_operand.vmem [shape: f32[1,32], index: 4, kind: input, shape index: {}]   ;;  %s843_s5 = inlined_call_operand.vmem [shape: f32[1,32], index: 5, kind: input, shape index: {}]   ;;  %s844_s6 = inlined_call_operand.hbm [shape: f32[2,32], index: 6, kind: output, shape index: {0}]   ;;  %s845_s7 = inlined_call_operand.hbm [shape: f32[2,8], index: 7, kind: output, shape index: {1}]  }
   0x1   :  { %14 = vsyncpa [#allocation6], 0 }
   0x2   :  { %15 = vsyncpa [#allocation9], 0 }
   0x3   :  { %16 = vsyncpa [#allocation4], 0 }
   0x4   :  { %17 = vsyncpa [#allocation12], 0  ;;  %s670_s24 = smov [#allocation5]   ;;  %s528_s28 = scalar_lea.hbm %s839_s1, 256 }
   0x5   :  { %s33_s25 = sshll.u32 %s670_s24, 4  ;;  %p529_p0 = scmp.ne.s32.totalorder %s839_s1, %s528_s28  ;;  %s34_s25 = int_to_ptr.vmem [resolvable:$true] %s33_s25 }
   0x6   :  { %p532_p1 = scmp.lt.u32.totalorder %s528_s28, %s839_s1 }
   0x8   :  { %p534_p2 = pnand %p532_p1, %p529_p0 }
   0xa   :  { %537 = shalt.err (!%p534_p2)
}
   0xb   :  { %s538_s10 = scalar_lea.vmem %s34_s25, 256  ;;  %p543_p4 = scmp.lt.s32.totalorder %s34_s25, %s34_s25 }
   0xc   :  { %p539_p3 = scmp.ne.s32.totalorder %s34_s25, %s538_s10  ;;  %p544_p5 = scmp.lt.s32.totalorder %s538_s10, %s538_s10 }
   0xe   :  { %p545_p6 = por %p544_p5, %p543_p4 }
  0x10   :  { %p546_p7 = pnand %p545_p6, %p539_p3 }
  0x12   :  { %549 = shalt.err (!%p546_p7)
}
  0x13   :  { %s671_s11 = smov 128   ;;  %s672_s12 = smov 8  }
  0x14   :  { %39 = dma.hbm_to_vmem [thread:$0]  %s839_s1, 256, %s34_s25, [#allocation6], %s671_s11, %s671_s11, %s672_s12  }
  0x15   :  { %s673_s15 = smov [#allocation2]   ;;  %s674_s17 = smov [#allocation7]  }
  0x16   :  { %s24_s16 = sshll.u32 %s673_s15, 4  ;;  %s45_s18 = sshll.u32 %s674_s17, 4  ;;  %s25_s16 = int_to_ptr.vmem [resolvable:$true] %s24_s16  ;;  %s46_s18 = int_to_ptr.vmem [resolvable:$true] %s45_s18 }
  0x17   :  { %s550_s21 = scalar_lea.hbm %s838_s0, 32 }
  0x18   :  { %p551_p8 = scmp.ne.s32.totalorder %s838_s0, %s550_s21  ;;  %p554_p9 = scmp.lt.u32.totalorder %s550_s21, %s838_s0 }
  0x1a   :  { %p556_p10 = pnand %p554_p9, %p551_p8 }
  0x1c   :  { %559 = shalt.err (!%p556_p10)
}
  0x1d   :  { %s560_s1 = scalar_lea.vmem %s25_s16, 32  ;;  %p565_p12 = scmp.lt.s32.totalorder %s25_s16, %s25_s16 }
  0x1e   :  { %p561_p11 = scmp.ne.s32.totalorder %s25_s16, %s560_s1  ;;  %p566_p13 = scmp.lt.s32.totalorder %s560_s1, %s560_s1 }
  0x20   :  { %p567_p0 = por %p566_p13, %p565_p12 }
  0x22   :  { %p568_p1 = pnand %p567_p0, %p561_p11 }
  0x24   :  { %571 = shalt.err (!%p568_p1)
}
  0x25   :  { %27 = dma.hbm_to_vmem [thread:$0]  %s838_s0, 32, %s25_s16, [#allocation3]  }
  0x26   :  { %s572_s30 = scalar_lea.hbm %s840_s2, 512 }
  0x27   :  { %p573_p2 = scmp.ne.s32.totalorder %s840_s2, %s572_s30  ;;  %p576_p3 = scmp.lt.u32.totalorder %s572_s30, %s840_s2 }
  0x29   :  { %p578_p4 = pnand %p576_p3, %p573_p2 }
  0x2b   :  { %581 = shalt.err (!%p578_p4)
}
  0x2c   :  { %s582_s14 = scalar_lea.vmem %s46_s18, 512  ;;  %p587_p6 = scmp.lt.s32.totalorder %s46_s18, %s46_s18 }
  0x2d   :  { %p583_p5 = scmp.ne.s32.totalorder %s46_s18, %s582_s14  ;;  %p588_p7 = scmp.lt.s32.totalorder %s582_s14, %s582_s14 }
  0x2f   :  { %p589_p8 = por %p588_p7, %p587_p6 }
  0x31   :  { %p590_p9 = pnand %p589_p8, %p583_p5 }
  0x33   :  { %593 = shalt.err (!%p590_p9)
}
  0x34   :  { %51 = dma.hbm_to_vmem [thread:$0]  %s840_s2, 512, %s46_s18, [#allocation6], %s671_s11, %s671_s11, %s672_s12  }
  0x35   :  { %s675_s16 = smov [#allocation8]   ;;  %s594_s21 = scalar_lea.hbm %s841_s3, 512 }
  0x36   :  { %s57_s17 = sshll.u32 %s675_s16, 4  ;;  %p595_p10 = scmp.ne.s32.totalorder %s841_s3, %s594_s21  ;;  %s58_s17 = int_to_ptr.vmem [resolvable:$true] %s57_s17 }
  0x37   :  { %p598_p11 = scmp.lt.u32.totalorder %s594_s21, %s841_s3 }
  0x39   :  { %p600_p12 = pnand %p598_p11, %p595_p10 }
  0x3b   :  { %603 = shalt.err (!%p600_p12)
}
  0x3c   :  { %s604_s1 = scalar_lea.vmem %s58_s17, 512  ;;  %p609_p0 = scmp.lt.s32.totalorder %s58_s17, %s58_s17 }
  0x3d   :  { %p605_p13 = scmp.ne.s32.totalorder %s58_s17, %s604_s1  ;;  %p610_p1 = scmp.lt.s32.totalorder %s604_s1, %s604_s1 }
  0x3f   :  { %p611_p2 = por %p610_p1, %p609_p0 }
  0x41   :  { %p612_p3 = pnand %p611_p2, %p605_p13 }
  0x43   :  { %615 = shalt.err (!%p612_p3)
}
  0x44   :  { %63 = dma.hbm_to_vmem [thread:$0]  %s841_s3, 512, %s58_s17, [#allocation9], %s671_s11, %s671_s11, %s672_s12  }
  0x45   :  { %660 = dma.done.wait [#allocation3], 32  }
  0x46   :  { %661 = vsyncadd [#allocation3], 4294967264 }
  0x47   :  { %662 = dma.done.wait [#allocation6], 768  }
  0x48   :  { %663 = vsyncadd [#allocation6], 4294966528 }
  0x49   :  { %664 = dma.done.wait [#allocation9], 512  }
  0x4a   :  { %665 = vsyncadd [#allocation9], 4294966784  ;;  %v676_v0 = vmov 0.0|0.0   ;;  %vm677_vm0 = vmmov 0   ;;  %v678_v1 = vmov 0.0   ;;  %v83_v2 = vld [vmem:[#allocation7] sm:$0xff]  ;;  %v257_v19 = vlaneseq }
  0x4b   :  { %489 = vmatprep.subr.bf16.mxu0 %v676_v0  ;;  %475 = vmatprep.mubr.msk.f32.mxu0 %vm677_vm0, %v678_v1  ;;  %v84_v3 = vld [vmem:[#allocation7 + $0x8] sm:$0xff]  ;;  %v85_v4 = vld [vmem:[#allocation7 + $0x10] sm:$0xff]  ;;  %v86_v6 = vld [vmem:[#allocation7 + $0x18] sm:$0xff]  ;;  %vm94_vm1 = vcmask 261120   ;;  %v679_v17 = vmov 1966171168  }
  0x4c   :  { %v490_v5 = vpack.c.bf16 %v84_v3, %v83_v2  ;;  %v168_v7 = vld [vmem:[#allocation8] sm:$0xff]  ;;  %v169_v8 = vld [vmem:[#allocation8 + $0x8] sm:$0xff]  ;;  %v170_v10 = vld [vmem:[#allocation8 + $0x10] sm:$0xff]  ;;  %v493_v12 = vpack.c.bf16 %v86_v6, %v85_v4  ;;  %v255_v18 = vunpack.c.l.s4 %v679_v17  ;;  %v789_v21 = vshrl.u32 %v257_v19, 7 }
  0x4d   :  { %v495_v9 = vpack.c.bf16 %v169_v8, %v168_v7  ;;  %v171_v11 = vld [vmem:[#allocation8 + $0x18] sm:$0xff]  ;;  %v780_v14 = vld [vmem:[#allocation5] sm:$0xff]  ;;  %v80_v15 = vld [vmem:[#allocation2] sm:$0x3]  ;;  %v308_v45 = vand.u32 127, %v257_v19  ;;  %vm317_vm2 = vcmask 1041409  }
  0x4e   :  { %491 = vmatpush3.bf16.msra.mxu0 %v490_v5  ;;  %v499_v13 = vpack.c.bf16 %v171_v11, %v170_v10  ;;  %486 = vmatprep.mubr.msk.f32.mxu1 %vm94_vm1, %v780_v14  ;;  %v784_v16 = vld [vmem:[#allocation5 + $0x8] sm:$0xff]  ;;  %v256_v20 = vunpack.c.0.s8 %v255_v18  ;;  %v451_v22 = vld [vmem:[%s842_s4] ss:$0 sm:$0xff]  ;;  %v278_v29 = vsub.s32 0, %v789_v21  ;;  %vm320_vm3 = vcmask 58368  }
  0x4f   :  { %492 = vmatprep.subr.bf16.mxu0 %v676_v0  ;;  %496 = vmatprep.subr.bf16.mxu1 %v495_v9  ;;  %v455_v38 = vld [vmem:[%s843_s5] ss:$0 sm:$0xff]  ;;  %v311_v47 = vsub.s32 %v308_v45, %v789_v21  ;;  %v680_v53 = vmov 0   ;;  %v331_v54 = vsub.s32 1, %v789_v21  ;;  %s681_s5 = smov [#allocation11]  }
  0x50   :  { %498 = vmatpush3.bf16.msra.mxu1 %v495_v9  ;;  %v259_v23 = vsub.s32 %v256_v20, %v789_v21  ;;  %517 = vset.pattern.permute.xlu0 %v680_v53  ;;  %s436_s25 = sshll.u32 %s681_s5, 4  ;;  %s437_s25 = int_to_ptr.vmem [resolvable:$true] %s436_s25 }
  0x51   :  { %500 = vmatprep.subr.bf16.mxu1 %v499_v13  ;;  %516 = vset.pattern.permute.xlu1 %v680_v53  ;;  %s616_s27 = scalar_lea.vmem %s437_s25, 32  ;;  %p621_p5 = scmp.lt.s32.totalorder %s437_s25, %s437_s25 }
  0x52   :  { %494 = vmatpush3.bf16.msra.mxu0 %v493_v12  ;;  %p617_p4 = scmp.ne.s32.totalorder %s437_s25, %s616_s27  ;;  %p622_p6 = scmp.lt.s32.totalorder %s616_s27, %s616_s27 }
  0x54   :  { %502 = vmatpush3.bf16.msra.mxu1 %v499_v13  ;;  %p623_p7 = por %p622_p6, %p621_p5 }
  0x55   :  { %476 = vmatmul.mubr.msk.f32.vlgmr.msra.gmra.mrb[0].mxu0 %vm94_vm1, %v80_v15 }
  0x56   :  { %p624_p8 = pnand %p623_p7, %p617_p4 }
  0x57   :  { %487 = vmatmul.mubr.msk.f32.vlgmr.msra.gmra.mrb[0].mxu1 %vm94_vm1, %v784_v16 }
 0x128   :  { %v164_v24 = vpop.f32.mrb[0].mxu0 }
 0x129   :  { %v165_v25 = vadd.f32 %v451_v22, %v164_v24  ;;  %v477_v26 = vpop.f32.mrb[1].mxu0 }
 0x12a   :  { %v488_v27 = vpop.f32.mrb[0].mxu1 }
 0x12b   :  { %v260_v28 = vrot.slane %v165_v25, %v259_v23  ;;  %v244_v30 = vpop.f32.mrb[1].mxu1 }
 0x12d   :  { %v261_v31 = vcombine.high %v260_v28, %v260_v28  ;;  %v268_v32 = vrot.slane %v260_v28, %v259_v23 }
 0x12f   :  { %v275_v33 = vrot.slane %v261_v31, %v259_v23  ;;  %v279_v34 = vrot.slane %v268_v32, %v278_v29 }
 0x131   :  { %v283_v35 = vrot.slane %v275_v33, %v278_v29  ;;  %v286_v36 = vadd.f32 %v279_v34, %v244_v30 }
 0x133   :  { %v287_v37 = vadd.f32 %v488_v27, %v283_v35  ;;  %518 = vtanh.f32 %v286_v36 }
 0x135   :  { %520 = vtanh.f32 %v287_v37 }
 0x13d   :  { %v519_v39 = vpop.eup %518 }
 0x13e   :  { %v297_v40 = vmul.f32 %v519_v39, %v455_v38 }
 0x13f   :  { %v521_v41 = vpop.eup %520 }
 0x140   :  { %v299_v42 = vsel %vm94_vm1, %v297_v40, 0.0  ;;  %v298_v43 = vmul.f32 %v521_v41, %v455_v38 }
 0x141   :  { %300 = vadd.xlane.f32.xlu0 %v299_v42 }
 0x142   :  { %v302_v44 = vsel %vm94_vm1, %v298_v43, 0.0 }
 0x145   :  { %303 = vadd.xlane.f32.xlu0 %v302_v44 }
 0x1ce   :  { %v301_v46 = vpop.xlane.xlu0 %300 }
 0x1cf   :  { %v312_v49 = vrot.slane %v301_v46, %v311_v47 }
 0x1d2   :  { %v304_v48 = vpop.xlane.xlu0 %303 }
 0x1d3   :  { %v316_v50 = vrot.slane %v304_v48, %v311_v47 }
 0x1d5   :  { %v318_v51 = vsel %vm317_vm2, %v316_v50, %v312_v49 }
 0x1d6   :  { %v321_v52 = vsel %vm320_vm3, %v318_v51, -inf }
 0x1d7   :  { %322 = vmax.xlane.f32.xlu1 %v321_v52 }
 0x264   :  { %v323_v55 = vpop.xlane.xlu1 %322 }
 0x265   :  { %v328_v56 = vrot.slane %v323_v55, %v278_v29  ;;  %v332_v57 = vrot.slane %v323_v55, %v331_v54 }
 0x267   :  { %v335_v58 = vsub.f32 %v301_v46, %v328_v56  ;;  %v336_v59 = vsub.f32 %v304_v48, %v332_v57 }
 0x269   :  { %v337_v60 = vmul.f32 1.442695, %v335_v58  ;;  %v339_v61 = vmul.f32 1.442695, %v336_v59 }
 0x26b   :  { %522 = vpow2.f32 %v337_v60 }
 0x26c   :  { %524 = vpow2.f32 %v339_v61 }
 0x275   :  { %v523_v62 = vpop.eup %522 }
 0x276   :  { %v525_v63 = vpop.eup %524  ;;  %344 = vperm.xlu1 %516, %v523_v62  }
 0x277   :  { %347 = vperm.xlu0 %517, %v525_v63  }
 0x2f5   :  { %v345_v0 = vpop.permute.xlu1 %344 }
 0x2f6   :  { %v348_v1 = vpop.permute.xlu0 %347  ;;  %v352_v2 = vrot.slane %v345_v0, %v311_v47 }
 0x2f7   :  { %v356_v3 = vrot.slane %v348_v1, %v311_v47 }
 0x2f9   :  { %v357_v4 = vsel %vm317_vm2, %v356_v3, %v352_v2 }
 0x2fa   :  { %v359_v5 = vsel %vm320_vm3, %v357_v4, 0.0 }
 0x2fb   :  { %360 = vadd.xlane.f32.xlu1 %v359_v5 }
 0x388   :  { %v361_v6 = vpop.xlane.xlu1 %360 }
 0x389   :  { %526 = vrcp.f32 %v361_v6 }
 0x393   :  { %v527_v7 = vpop.eup %526 }
 0x394   :  { %v368_v8 = vrot.slane %v527_v7, %v278_v29  ;;  %v372_v10 = vrot.slane %v527_v7, %v331_v54 }
 0x396   :  { %v375_v9 = vmul.f32 %v523_v62, %v368_v8  ;;  %v376_v11 = vmul.f32 %v525_v63, %v372_v10 }
 0x398   :  { %379 = vperm.xlu0 %517, %v375_v9  }
 0x39c   :  { %384 = vperm.xlu0 %517, %v376_v11  }
 0x417   :  { %v380_v12 = vpop.permute.xlu0 %379 }
 0x418   :  { %v387_v13 = vmul.f32 %v380_v12, %v780_v14  ;;  %v412_v19 = vrot.slane %v380_v12, %v311_v47 }
 0x41a   :  { %v389_v15 = vsel %vm94_vm1, %v387_v13, 0.0 }
 0x41b   :  { %v390_v17 = vrot.slane %v389_v15, 4  ;;  %v385_v18 = vpop.permute.xlu0 %384 }
 0x41c   :  { %v388_v20 = vmul.f32 %v385_v18, %v784_v16  ;;  %v416_v21 = vrot.slane %v385_v18, %v311_v47 }
 0x41d   :  { %v391_v22 = vadd.f32 %v390_v17, %v389_v15 }
 0x41e   :  { %v396_v23 = vsel %vm94_vm1, %v388_v20, 0.0  ;;  %v417_v24 = vsel %vm317_vm2, %v416_v21, %v412_v19 }
 0x41f   :  { %v392_v25 = vrot.slane %v391_v22, 2  ;;  %v397_v26 = vrot.slane %v396_v23, 4  ;;  %419 = vst.msk [vmem:[#allocation11] sm:$0x3] %vm320_vm3, %v417_v24 }
 0x420   :  { %627 = shalt.err (!%p624_p8)
}
 0x421   :  { %s628_s30 = scalar_lea.hbm %s845_s7, 32 }
 0x422   :  { %p629_p9 = scmp.ne.s32.totalorder %s845_s7, %s628_s30  ;;  %p632_p10 = scmp.lt.u32.totalorder %s628_s30, %s845_s7 }
 0x424   :  { %p634_p11 = pnand %p632_p10, %p629_p9 }
 0x426   :  { %637 = shalt.err (!%p634_p11)
}
 0x427   :  { %439 = dma.vmem_to_hbm [thread:$0]  %s437_s25, 32, %s845_s7, [#allocation12]   ;;  %v393_v14 = vadd.f32 %v392_v25, %v391_v22  ;;  %v398_v16 = vadd.f32 %v397_v26, %v396_v23  ;;  %vm407_vm4 = vcmask 254976  }
 0x428   :  { %s682_s15 = smov [#allocation10]  }
 0x429   :  { %v399_v27 = vrot.slane %v398_v16, 2  ;;  %v394_v28 = vrot.slane %v393_v14, 1  ;;  %s426_s16 = sshll.u32 %s682_s15, 4  ;;  %s427_s16 = int_to_ptr.vmem [resolvable:$true] %s426_s16 }
 0x42a   :  { %s638_s17 = scalar_lea.vmem %s427_s16, 32  ;;  %p643_p13 = scmp.lt.s32.totalorder %s427_s16, %s427_s16 }
 0x42b   :  { %v400_v29 = vadd.f32 %v399_v27, %v398_v16  ;;  %v395_v32 = vadd.f32 %v394_v28, %v393_v14  ;;  %p639_p12 = scmp.ne.s32.totalorder %s427_s16, %s638_s17  ;;  %p644_p0 = scmp.lt.s32.totalorder %s638_s17, %s638_s17 }
 0x42d   :  { %v401_v30 = vrot.slane %v400_v29, 1  ;;  %p645_p1 = por %p644_p0, %p643_p13 }
 0x42f   :  { %v402_v31 = vadd.f32 %v401_v30, %v400_v29  ;;  %p646_p2 = pnand %p645_p1, %p639_p12 }
 0x431   :  { %v405_v33 = vsel %vm317_vm2, %v402_v31, %v395_v32 }
 0x432   :  { %408 = vst.msk [vmem:[#allocation10] sm:$0x3] %vm407_vm4, %v405_v33 }
 0x433   :  { %649 = shalt.err (!%p646_p2)
}
 0x434   :  { %s650_s20 = scalar_lea.hbm %s844_s6, 32 }
 0x435   :  { %p651_p3 = scmp.ne.s32.totalorder %s844_s6, %s650_s20  ;;  %p654_p4 = scmp.lt.u32.totalorder %s650_s20, %s844_s6 }
 0x437   :  { %p656_p5 = pnand %p654_p4, %p651_p3 }
 0x439   :  { %659 = shalt.err (!%p656_p5)
}
 0x43a   :  { %429 = dma.vmem_to_hbm [thread:$0]  %s427_s16, 32, %s844_s6, [#allocation4]  }
 0x43b   :  { %666 = dma.done.wait [#allocation4], 32  }
 0x43c   :  { %667 = vsyncadd [#allocation4], 4294967264 }
 0x43d   :  { %668 = dma.done.wait [#allocation12], 32  }
 0x43e   :  { %669 = vsyncadd [#allocation12], 4294967264 }
 0x43f   :  { %446 = vsyncpa [#allocation3], 1 }
 0x440   :  { %447 = vsyncpa [#allocation6], 1 }
 0x441   :  { %448 = vsyncpa [#allocation9], 1 }
 0x442   :  { %449 = vsyncpa [#allocation4], 1 }
 0x443   :  { %450 = vsyncpa [#allocation12], 1 }

</bundles_post_ra>
